<compile_context>
chip_gen: v7x
topology: tpu7x:2x2x1
jax: 0.10.0
libtpu: 0.0.40
codegen_flags: <defaults>
</compile_context>

<pallas_src>
import math

import jax
import jax.numpy as jnp
from jax.experimental import pallas as pl
from jax.experimental.pallas import tpu as pltpu


# -----------------------------------------------------------------------------
# Kernel 1: projection  XW = features @ W^T  (runs once, hoisted out of the
# per-adj-row-block loop).
# -----------------------------------------------------------------------------
def _project_kernel(feat_ref, wt_ref, xw_ref):
    """feat_ref: (block_r, C_in)  wt_ref: (C_in, C_out_pad)  xw_ref: (block_r, C_out_pad)."""
    xw_ref[...] = jnp.dot(
        feat_ref[...], wt_ref[...], preferred_element_type=jnp.float32
    ).astype(xw_ref.dtype)


# -----------------------------------------------------------------------------
# Kernel 2: Y = adj @ XW + bias  (K-tiled, f32 accumulator, lane-dense output).
# -----------------------------------------------------------------------------
def _adj_matmul_kernel(adj_ref, xw_ref, bias_ref, out_ref, acc_ref):
    """adj_ref: (block_m, block_k)  xw_ref: (block_k, lane_w)  bias_ref: (1, lane_w)
    out_ref: (block_m, lane_w)      acc_ref: (block_m, lane_w) f32 scratch."""
    k = pl.program_id(1)

    @pl.when(k == 0)
    def _():
        acc_ref[...] = jnp.zeros_like(acc_ref)

    acc_ref[...] += jnp.dot(adj_ref[...], xw_ref[...],
                            preferred_element_type=jnp.float32)

    @pl.when(k == pl.num_programs(1) - 1)
    def _():
        out_ref[...] = (acc_ref[...] + bias_ref[...]).astype(out_ref.dtype)


def graph_convolution(adj, features, weight, bias, *,
                      block_m=256, block_k=1024, block_r=256,
                      stream_dtype=jnp.bfloat16):
    """adj: (N,N), features: (B,N,C_in), weight: (C_out,C_in) torch-Linear layout, bias: (C_out,).

    Returns (B, 4, N*C_out//4) float32, matching the PyTorch module up to matmul
    re-association and (optional) bf16 streaming of the adjacency operand.
    """
    B, N, C_in = features.shape
    C_out = weight.shape[0]
    assert adj.shape == (N, N)
    assert (N * C_out) % 4 == 0, "module reshapes each (N, C_out) result to (4, -1)"

    # ---- lane-dense output padding: make B*C_out_pad a multiple of 128 -------
    # (On v6e/v7x a 256-lane multiple fills the 2x256 MXU even better; the
    #  minimal 128 pad keeps the padded xw slab smaller, which matters more for
    #  this HBM-bound kernel.)
    pad_unit = 128 // math.gcd(B, 128)
    C_out_pad = ((C_out + pad_unit - 1) // pad_unit) * pad_unit
    lane_w = B * C_out_pad                          # multiple of 128 -> unmasked vst

    # Layout prep done once in the wrapper (not per grid step).
    w_t = jnp.transpose(weight)                                   # (C_in, C_out)
    w_t_pad = jnp.pad(w_t, ((0, 0), (0, C_out_pad - C_out)))      # zero-pad columns
    bias_pad = jnp.pad(bias, (0, C_out_pad - C_out))
    bias_t = jnp.tile(bias_pad, B).reshape(1, lane_w).astype(jnp.float32)

    # ---- kernel 1: projection (once, over B*N rows) --------------------------
    rows = B * N
    blk_r = min(block_r, rows)
    feat_2d = features.reshape(rows, C_in)
    xw_flat = pl.pallas_call(
        _project_kernel,
        out_shape=jax.ShapeDtypeStruct((rows, C_out_pad), stream_dtype),
        grid_spec=pltpu.PrefetchScalarGridSpec(
            num_scalar_prefetch=0,
            grid=(pl.cdiv(rows, blk_r),),
            in_specs=[
                pl.BlockSpec((blk_r, C_in), lambda i: (i, 0)),
                pl.BlockSpec((C_in, C_out_pad), lambda i: (0, 0)),
            ],
            out_specs=pl.BlockSpec((blk_r, C_out_pad), lambda i: (i, 0)),
        ),
        compiler_params=pltpu.CompilerParams(dimension_semantics=("parallel",)),
    )(feat_2d, w_t_pad)

    # Pure XLA layout work: (B*N, C_out_pad) -> node-major (N, B*C_out_pad), so
    # one adjacency matmul covers every batch element (lane = b*C_out_pad + c).
    xw_nm = xw_flat.reshape(B, N, C_out_pad).transpose(1, 0, 2).reshape(N, lane_w)

    # ---- kernel 2: adj @ XW + bias --------------------------------------------
    adj_s = adj.astype(stream_dtype)    # halve HBM bytes on the dominant operand

    blk_m = min(block_m, N)
    if N >= 512 and pl.cdiv(N, blk_m) < 2:
        # Keep >=2 row blocks so the "parallel" axis can feed both v7x TensorCores.
        blk_m = ((pl.cdiv(N, 2) + 7) // 8) * 8
    blk_k = min(block_k, N)
    if N % blk_k != 0:
        blk_k = N                       # ragged K blocks would pollute the reduction
    grid = (pl.cdiv(N, blk_m), N // blk_k)

    stream_bytes = jnp.dtype(stream_dtype).itemsize
    vmem_needed = (2 * blk_m * blk_k * stream_bytes       # adj tile, double-buffered
                   + 2 * blk_k * lane_w * stream_bytes    # xw K-slab
                   + 2 * blk_m * lane_w * 4               # output block
                   + 2 * lane_w * 4                       # bias
                   + blk_m * lane_w * 4)                  # f32 accumulator scratch
    vmem_limit = int(min(max(vmem_needed * 1.25 + (2 << 20), 4 << 20), 64 << 20))

    out_nm = pl.pallas_call(
        _adj_matmul_kernel,
        out_shape=jax.ShapeDtypeStruct((N, lane_w), jnp.float32),
        grid_spec=pltpu.PrefetchScalarGridSpec(
            num_scalar_prefetch=0,
            grid=grid,
            in_specs=[
                pl.BlockSpec((blk_m, blk_k), lambda i, k: (i, k)),   # adj tile
                pl.BlockSpec((blk_k, lane_w), lambda i, k: (k, 0)),  # xw K-slab
                pl.BlockSpec((1, lane_w), lambda i, k: (0, 0)),      # tiled bias
            ],
            out_specs=pl.BlockSpec((blk_m, lane_w), lambda i, k: (i, 0)),
            scratch_shapes=[pltpu.VMEM((blk_m, lane_w), jnp.float32)],
        ),
        compiler_params=pltpu.CompilerParams(
            dimension_semantics=("parallel", "arbitrary"),
            vmem_limit_bytes=vmem_limit),
    )(adj_s, xw_nm, bias_t)

    # Drop zero-padded lanes, go batch-major, reshape exactly like torch's
    # per-batch reshape((1, 4, -1)) + cat(dim=0).
    out = out_nm.reshape(N, B, C_out_pad)[:, :, :C_out]
    return out.transpose(1, 0, 2).reshape(B, 4, -1)


if __name__ == "__main__":
    B, N, C_in, C_out = 2, 8, 32, 16   # N*C_out divisible by 4

    key = jax.random.PRNGKey(0)
    k_adj, k_feat, k_w, k_b = jax.random.split(key, 4)

    adj = jax.random.normal(k_adj, (N, N), dtype=jnp.float32)
    features = jax.random.normal(k_feat, (B, N, C_in), dtype=jnp.float32)

    # nn.Linear default init: U(-1/sqrt(C_in), 1/sqrt(C_in))
    bound = 1.0 / (C_in ** 0.5)
    weight = jax.random.uniform(k_w, (C_out, C_in), jnp.float32, -bound, bound)
    bias = jax.random.uniform(k_b, (C_out,), jnp.float32, -bound, bound)

    # Pure-JAX reference in the original op order.
    ref = (jnp.einsum("nm,bmc->bnc", adj, features) @ weight.T + bias).reshape(B, 4, -1)

    # f32 streaming path: tight check (only matmul re-association differs).
    out_f32 = jax.block_until_ready(
        graph_convolution(adj, features, weight, bias, stream_dtype=jnp.float32))
    assert out_f32.shape == (B, 4, (N * C_out) // 4)
    assert jnp.allclose(out_f32, ref, atol=1e-4, rtol=1e-4), float(
        jnp.max(jnp.abs(out_f32 - ref)))

    # Default bf16 streaming path (halves HBM traffic on adj): looser tolerance.
    out_bf16 = jax.block_until_ready(graph_convolution(adj, features, weight, bias))
    assert out_bf16.shape == (B, 4, (N * C_out) // 4)
    assert jnp.allclose(out_bf16, ref, atol=5e-2, rtol=5e-2), float(
        jnp.max(jnp.abs(out_bf16 - ref)))

    print("KERNEL_OK")
</pallas_src>

<mosaic_0001>
module attributes {stable_mosaic.version = 11 : i64} {
  func.func @_project_kernel(%arg0: i32, %arg1: memref<16x32xf32, #tpu.memory_space<vmem>>, %arg2: memref<32x64xf32, #tpu.memory_space<vmem>>, %arg3: memref<16x64xf32, #tpu.memory_space<vmem>>) attributes {dimension_semantics = [#tpu.dimension_semantics<parallel>], iteration_bounds = array<i64: 1>, scalar_prefetch = 0 : i64, scratch_operands = 0 : i64, tpu.core_type = #tpu.core_type<tc>, window_params = [{transform_indices = @transform_0, window_bounds = array<i64: 16, 32>}, {pipeline_mode = #tpu.pipeline_mode<synchronous>, transform_indices = @transform_1, window_bounds = array<i64: 32, 64>}, {transform_indices = @transform_2, window_bounds = array<i64: 16, 64>}]} {
    %c0 = arith.constant 0 : index
    %c0_0 = arith.constant 0 : index
    %0 = vector.load %arg1[%c0, %c0_0] : memref<16x32xf32, #tpu.memory_space<vmem>>, vector<16x32xf32>
    %c0_1 = arith.constant 0 : index
    %c0_2 = arith.constant 0 : index
    %1 = vector.load %arg2[%c0_1, %c0_2] : memref<32x64xf32, #tpu.memory_space<vmem>>, vector<32x64xf32>
    %cst = arith.constant dense<0.000000e+00> : vector<16x64xf32>
    %2 = tpu.matmul %0, %1, %cst {dimension_numbers = #tpu.dot_dimension_numbers<[1], [0], [0], [1], [0, 0, 1, 1], [], []>} : vector<16x32xf32>, vector<32x64xf32>, vector<16x64xf32> -> vector<16x64xf32>
    %c0_3 = arith.constant 0 : index
    %c0_4 = arith.constant 0 : index
    %3 = vector.load %arg3[%c0_3, %c0_4] : memref<16x64xf32, #tpu.memory_space<vmem>>, vector<16x64xf32>
    tpu.vector_store %arg3[%c0_3, %c0_4], %2 {strides = array<i32>} : memref<16x64xf32, #tpu.memory_space<vmem>>, vector<16x64xf32>,
    return
  }
  func.func @transform_0(%arg0: i32) -> (i32, i32) {
    %c0_i32 = arith.constant 0 : i32
    %c0_i32_0 = arith.constant 0 : i32
    return %arg0, %c0_i32 : i32, i32
  }
  func.func @transform_1(%arg0: i32) -> (i32, i32) {
    %c0_i32 = arith.constant 0 : i32
    %c0_i32_0 = arith.constant 0 : i32
    %c0_i32_1 = arith.constant 0 : i32
    return %c0_i32, %c0_i32_0 : i32, i32
  }
  func.func @transform_2(%arg0: i32) -> (i32, i32) {
    %c0_i32 = arith.constant 0 : i32
    %c0_i32_0 = arith.constant 0 : i32
    return %arg0, %c0_i32 : i32, i32
  }
}

</mosaic_0001>

<bundles_post_ra>
// kernel: tpu_custom_call.1
= control target key start
LH: loop header
LB: loop body
LE: loop exit
PB: predicated region body
PF: predicated region fallthrough
CT: control target
= control target key end

     0   :  { %7 = vsyncpa [#allocation3], 0  ;;  %s318_s0 = inlined_call_operand.hbm [shape: f32[16,32], index: 0, kind: input, shape index: {}]   ;;  %s319_s1 = inlined_call_operand.hbm [shape: f32[32,64], index: 1, kind: input, shape index: {}]   ;;  %s320_s2 = inlined_call_operand.hbm [shape: f32[16,64], index: 2, kind: output, shape index: {}]  }
   0x1   :  { %8 = vsyncpa [#allocation6], 0 }
   0x2   :  { %9 = vsyncpa [#allocation4], 0  ;;  %s253_s9 = smov [#allocation2]   ;;  %s181_s13 = scalar_lea.hbm %s318_s0, 256 }
   0x3   :  { %s15_s10 = sshll.u32 %s253_s9, 4  ;;  %p182_p0 = scmp.ne.s32.totalorder %s318_s0, %s181_s13  ;;  %s16_s10 = int_to_ptr.vmem [resolvable:$true] %s15_s10 }
   0x4   :  { %p185_p1 = scmp.lt.u32.totalorder %s181_s13, %s318_s0 }
   0x6   :  { %p187_p2 = pnand %p185_p1, %p182_p0 }
   0x8   :  { %190 = shalt.err (!%p187_p2)
}
   0x9   :  { %s191_s18 = scalar_lea.vmem %s16_s10, 256  ;;  %p196_p4 = scmp.lt.s32.totalorder %s16_s10, %s16_s10 }
   0xa   :  { %p192_p3 = scmp.ne.s32.totalorder %s16_s10, %s191_s18  ;;  %p197_p5 = scmp.lt.s32.totalorder %s191_s18, %s191_s18 }
   0xc   :  { %p198_p6 = por %p197_p5, %p196_p4 }
   0xe   :  { %p199_p7 = pnand %p198_p6, %p192_p3 }
  0x10   :  { %202 = shalt.err (!%p199_p7)
}
  0x11   :  { %s254_s19 = smov 128   ;;  %s255_s20 = smov 8  }
  0x12   :  { %21 = dma.hbm_to_vmem [thread:$0]  %s318_s0, 256, %s16_s10, [#allocation3], %s254_s19, %s254_s19, %s255_s20  }
  0x13   :  { %s256_s23 = smov [#allocation5]   ;;  %s203_s27 = scalar_lea.hbm %s319_s1, 512 }
  0x14   :  { %s27_s24 = sshll.u32 %s256_s23, 4  ;;  %p204_p8 = scmp.ne.s32.totalorder %s319_s1, %s203_s27  ;;  %s28_s24 = int_to_ptr.vmem [resolvable:$true] %s27_s24 }
  0x15   :  { %p207_p9 = scmp.lt.u32.totalorder %s203_s27, %s319_s1 }
  0x17   :  { %p209_p10 = pnand %p207_p9, %p204_p8 }
  0x19   :  { %212 = shalt.err (!%p209_p10)
}
  0x1a   :  { %s213_s4 = scalar_lea.vmem %s28_s24, 512  ;;  %p218_p12 = scmp.lt.s32.totalorder %s28_s24, %s28_s24 }
  0x1b   :  { %p214_p11 = scmp.ne.s32.totalorder %s28_s24, %s213_s4  ;;  %p219_p13 = scmp.lt.s32.totalorder %s213_s4, %s213_s4 }
  0x1d   :  { %p220_p0 = por %p219_p13, %p218_p12 }
  0x1f   :  { %p221_p1 = pnand %p220_p0, %p214_p11 }
  0x21   :  { %224 = shalt.err (!%p221_p1)
}
  0x22   :  { %33 = dma.hbm_to_vmem [thread:$0]  %s319_s1, 512, %s28_s24, [#allocation6], %s254_s19, %s254_s19, %s255_s20  }
  0x23   :  { %247 = dma.done.wait [#allocation3], 256  }
  0x24   :  { %248 = vsyncadd [#allocation3], 4294967040 }
  0x25   :  { %249 = dma.done.wait [#allocation6], 512  }
  0x26   :  { %250 = vsyncadd [#allocation6], 4294966784  ;;  %vm46_vm0 = vcmask 261120   ;;  %v42_v0 = vld [vmem:[#allocation5] sm:$0xff]  ;;  %v43_v1 = vld [vmem:[#allocation5 + $0x8] sm:$0xff]  ;;  %s257_s1 = smov [#allocation7]  }
  0x27   :  { %v44_v2 = vld [vmem:[#allocation5 + $0x10] sm:$0xff]  ;;  %v168_v3 = vpack.c.bf16 %v43_v1, %v42_v0  ;;  %v45_v4 = vld [vmem:[#allocation5 + $0x18] sm:$0xff]  ;;  %s136_s6 = sshll.u32 %s257_s1, 4  ;;  %vm128_vm1 = vcmask 523264   ;;  %s137_s6 = int_to_ptr.vmem [resolvable:$true] %s136_s6 }
  0x28   :  { %v40_v5 = vld [vmem:[#allocation2] sm:$0xff]  ;;  %v172_v6 = vpack.c.bf16 %v45_v4, %v44_v2  ;;  %v41_v7 = vld [vmem:[#allocation2 + $0x8] sm:$0xff]  ;;  %s225_s7 = scalar_lea.vmem %s137_s6, 256  ;;  %p230_p3 = scmp.lt.s32.totalorder %s137_s6, %s137_s6 }
  0x29   :  { %165 = vmatprep.mubr.msk.f32.mxu0 %vm46_vm0, %v40_v5  ;;  %169 = vmatprep.subr.bf16.mxu0 %v168_v3  ;;  %p226_p2 = scmp.ne.s32.totalorder %s137_s6, %s225_s7  ;;  %p231_p4 = scmp.lt.s32.totalorder %s225_s7, %s225_s7 }
  0x2a   :  { %171 = vmatpush3.bf16.msra.mxu0 %v168_v3 }
  0x2b   :  { %173 = vmatprep.subr.bf16.mxu0 %v172_v6  ;;  %p232_p5 = por %p231_p4, %p230_p3 }
  0x2d   :  { %p233_p6 = pnand %p232_p5, %p226_p2 }
  0x2e   :  { %175 = vmatpush3.bf16.msra.mxu0 %v172_v6 }
  0x31   :  { %166 = vmatmul.mubr.msk.f32.vlgmr.msra.gmra.mrb[0].mxu0 %vm46_vm0, %v41_v7 }
 0x104   :  { %v167_v8 = vpop.f32.mrb[0].mxu0 }
 0x105   :  { %130 = vst.msk [vmem:[#allocation7 + $0x8] sm:$0xff] %vm128_vm1, %v167_v8  ;;  %v119_v9 = vpop.f32.mrb[1].mxu0 }
 0x106   :  { %129 = vst.msk [vmem:[#allocation7] sm:$0xff] %vm128_vm1, %v119_v9 }
 0x107   :  { %236 = shalt.err (!%p233_p6)
}
 0x108   :  { %s237_s10 = scalar_lea.hbm %s320_s2, 256 }
 0x109   :  { %p238_p7 = scmp.ne.s32.totalorder %s320_s2, %s237_s10  ;;  %p241_p8 = scmp.lt.u32.totalorder %s237_s10, %s320_s2 }
 0x10b   :  { %p243_p9 = pnand %p241_p8, %p238_p7 }
 0x10d   :  { %246 = shalt.err (!%p243_p9)
}
 0x10e   :  { %142 = dma.vmem_to_hbm [thread:$0]  %s137_s6, 256, %s320_s2, [#allocation4], %s254_s19, %s254_s19, %s255_s20  }
 0x10f   :  { %251 = dma.done.wait [#allocation4], 256  }
 0x110   :  { %252 = vsyncadd [#allocation4], 4294967040 }
 0x111   :  { %146 = vsyncpa [#allocation3], 1 }
 0x112   :  { %147 = vsyncpa [#allocation6], 1 }
 0x113   :  { %148 = vsyncpa [#allocation4], 1 }

</bundles_post_ra>
